<compile_context>
chip_gen: v7x
topology: tpu7x:2x2x1
jax: 0.10.0
libtpu: 0.0.40
codegen_flags: <defaults>
</compile_context>

<pallas_src>
import jax
import jax.numpy as jnp
from jax import lax
from jax.experimental import pallas as pl
from jax.experimental.pallas import tpu as pltpu

MAX_TE = 65536     # max lanes per grid step (0.75 MiB / input block)
LANE_ALIGN = 512   # lane-tile alignment (multiple of 128)


def _round_up(x, m):
    return ((x + m - 1) // m) * m


def _cdiv(a, b):
    return (a + b - 1) // b


def _normal_loss_kernel(diff_ref, n_ref, out_ref):
    """diff/n: (D, TE) f32 blocks, out: (1, 1, 1) f32 per-block partial sum."""
    eps2 = jnp.float32(1e-24)    # F.normalize eps (1e-12) applied to squared norms
    tiny = jnp.float32(1.2e-38)  # >= f32 min-normal: keeps rsqrt finite on zero lanes

    d = diff_ref[...]                                    # pred[e0] - pred[e1]
    n = n_ref[...]                                       # nearest gt normal at e0

    dot = jnp.sum(d * n, axis=0, keepdims=True)          # (1, TE)
    ssd = jnp.sum(d * d, axis=0, keepdims=True)          # (1, TE)
    ssn = jnp.sum(n * n, axis=0, keepdims=True)          # (1, TE)

    # (d/|d| . n/|n|)^2 with the same eps clamp semantics as F.normalize, using a
    # single rsqrt.  Padded / masked lanes have d == 0 -> dot == 0 -> loss == 0.
    inv = lax.rsqrt(jnp.maximum(jnp.maximum(ssd, eps2) * jnp.maximum(ssn, eps2), tiny))
    ndot = dot * inv
    loss = ndot * ndot                                   # (1, TE)

    out_ref[...] = jnp.sum(loss, axis=1, keepdims=True).reshape(1, 1, 1)


@jax.jit
def normal_loss(pred, nearest_gt_idx, gt_normals, edge_list):
    """pred: (P, D) f32, nearest_gt_idx: (1, P) i32, gt_normals: (1, G, D) f32,
    edge_list: (2, E) i32.  Returns scalar f32 loss (mean over masked edges)."""
    num_points, points_dim = pred.shape
    e0 = edge_list[0]
    e1 = edge_list[1]
    num_edges = e0.shape[0]

    # Denominator: number of unmasked edges (scalar, stays in the wrapper).
    # NOTE: like the PyTorch reference, den == 0 (all edges masked) yields NaN.
    edge_mask = (e0 != 0) | (e1 != 0)
    den = jnp.sum(edge_mask.astype(jnp.float32))

    # ---- glue: data-dependent gathers (torch.gather equivalents) ----
    # Gathering along the lane axis of pre-transposed (D, N) tables avoids a
    # separate (E, D) -> (D, E) transpose pass.  Masked edges (e0 == e1 == 0)
    # give diff == 0 exactly, so they contribute 0 to the kernel's numerator.
    pred_t = pred.astype(jnp.float32).T                                   # (D, P)
    gtn_t = gt_normals[0].astype(jnp.float32).T                           # (D, G)

    diff_t = jnp.take(pred_t, e0, axis=1) - jnp.take(pred_t, e1, axis=1)  # (D, E)
    n_idx = jnp.take(nearest_gt_idx[0], e0)                               # (E,)
    n_t = jnp.take(gtn_t, n_idx, axis=1)                                  # (D, E)

    # ---- lane tiling: bound tail padding, keep >= 2 (even) blocks ----
    num_blocks = max(2, _cdiv(num_edges, MAX_TE))
    if num_blocks % 2:
        num_blocks += 1                       # even -> both TensorCores on v7x
    te = _round_up(_cdiv(num_edges, num_blocks), LANE_ALIGN)
    e_pad = te * num_blocks
    pad = e_pad - num_edges
    diff_t = jnp.pad(diff_t, ((0, 0), (0, pad)))
    n_t = jnp.pad(n_t, ((0, 0), (0, pad)))

    partials = pl.pallas_call(
        _normal_loss_kernel,
        out_shape=jax.ShapeDtypeStruct((num_blocks, 1, 1), jnp.float32),
        grid_spec=pltpu.PrefetchScalarGridSpec(
            num_scalar_prefetch=0,
            grid=(num_blocks,),
            in_specs=[
                # first dim == full array extent (3), so no 8-divisibility needed
                pl.BlockSpec((points_dim, te), lambda i: (0, i)),
                pl.BlockSpec((points_dim, te), lambda i: (0, i)),
            ],
            out_specs=pl.BlockSpec((1, 1, 1), lambda i: (i, 0, 0)),
        ),
        compiler_params=pltpu.CompilerParams(
            dimension_semantics=("parallel",)),
    )(diff_t, n_t)

    return jnp.sum(partials) / den


def _reference(pred, nearest_gt_idx, gt_normals, edge_list):
    """Pure-JAX reference mirroring the PyTorch forward."""
    eps = 1e-12
    nearest = gt_normals[0][nearest_gt_idx[0]]
    e0, e1 = edge_list[0], edge_list[1]
    mask = (e0 != 0) | (e1 != 0)
    n = nearest[e0]
    n = n / jnp.maximum(jnp.linalg.norm(n, axis=1, keepdims=True), eps)
    d = pred[e0] - pred[e1]
    d = d / jnp.maximum(jnp.linalg.norm(d, axis=1, keepdims=True), eps)
    loss = jnp.sum(d * n, axis=1) ** 2
    return jnp.sum(jnp.where(mask, loss, 0.0)) / jnp.sum(mask.astype(jnp.float32))


if __name__ == "__main__":
    key = jax.random.PRNGKey(0)
    k1, k2, k3, k4, k5 = jax.random.split(key, 5)

    num_points, points_dim = 64, 3
    num_gt = 32
    num_edges = 300

    pred = jax.random.normal(k1, (num_points, points_dim), jnp.float32)
    gt_normals = jax.random.normal(k2, (1, num_gt, points_dim), jnp.float32)
    nearest_gt_idx = jax.random.randint(k3, (1, num_points), 0, num_gt, jnp.int32)
    e0 = jax.random.randint(k4, (num_edges,), 0, num_points, jnp.int32)
    e1 = jax.random.randint(k5, (num_edges,), 0, num_points, jnp.int32)
    # make the tail edges (0, 0) so the edge_mask path is exercised
    e0 = e0.at[-20:].set(0)
    e1 = e1.at[-20:].set(0)
    edge_list = jnp.stack([e0, e1], axis=0)

    out = normal_loss(pred, nearest_gt_idx, gt_normals, edge_list)
    out = jax.block_until_ready(out)

    ref = _reference(pred, nearest_gt_idx, gt_normals, edge_list)
    assert bool(jnp.isfinite(out)), out
    assert jnp.allclose(out, ref, rtol=1e-4, atol=1e-5), (out, ref)
    print("KERNEL_OK")
</pallas_src>

<mosaic_0001>
module attributes {stable_mosaic.version = 11 : i64} {
  func.func @_normal_loss_kernel(%arg0: i32, %arg1: memref<3x512xf32, #tpu.memory_space<vmem>>, %arg2: memref<3x512xf32, #tpu.memory_space<vmem>>, %arg3: memref<1x1x1xf32, #tpu.memory_space<vmem>>) attributes {dimension_semantics = [#tpu.dimension_semantics<parallel>], iteration_bounds = array<i64: 2>, scalar_prefetch = 0 : i64, scratch_operands = 0 : i64, tpu.core_type = #tpu.core_type<tc>, window_params = [{transform_indices = @transform_0, window_bounds = array<i64: 3, 512>}, {transform_indices = @transform_1, window_bounds = array<i64: 3, 512>}, {transform_indices = @transform_2, window_bounds = array<i64: 1, 1, 1>}]} {
    %c0 = arith.constant 0 : index
    %c0_0 = arith.constant 0 : index
    %0 = vector.load %arg1[%c0, %c0_0] : memref<3x512xf32, #tpu.memory_space<vmem>>, vector<3x512xf32>
    %c0_1 = arith.constant 0 : index
    %c0_2 = arith.constant 0 : index
    %1 = vector.load %arg2[%c0_1, %c0_2] : memref<3x512xf32, #tpu.memory_space<vmem>>, vector<3x512xf32>
    %2 = arith.mulf %0, %1 : vector<3x512xf32>
    %cst = arith.constant dense<0.000000e+00> : vector<512xf32>
    %3 = vector.multi_reduction <add>, %2, %cst [0] : vector<3x512xf32> to vector<512xf32>
    %4 = vector.shape_cast %3 : vector<512xf32> to vector<1x512xf32>
    %5 = arith.mulf %0, %0 : vector<3x512xf32>
    %cst_3 = arith.constant dense<0.000000e+00> : vector<512xf32>
    %6 = vector.multi_reduction <add>, %5, %cst_3 [0] : vector<3x512xf32> to vector<512xf32>
    %7 = vector.shape_cast %6 : vector<512xf32> to vector<1x512xf32>
    %8 = arith.mulf %1, %1 : vector<3x512xf32>
    %cst_4 = arith.constant dense<0.000000e+00> : vector<512xf32>
    %9 = vector.multi_reduction <add>, %8, %cst_4 [0] : vector<3x512xf32> to vector<512xf32>
    %10 = vector.shape_cast %9 : vector<512xf32> to vector<1x512xf32>
    %cst_5 = arith.constant 1.000000e-24 : f32
    %11 = vector.broadcast %cst_5 : f32 to vector<1x512xf32>
    %12 = arith.maximumf %7, %11 : vector<1x512xf32>
    %cst_6 = arith.constant 1.000000e-24 : f32
    %13 = vector.broadcast %cst_6 : f32 to vector<1x512xf32>
    %14 = arith.maximumf %10, %13 : vector<1x512xf32>
    %15 = arith.mulf %12, %14 : vector<1x512xf32>
    %cst_7 = arith.constant 1.200000e-38 : f32
    %16 = vector.broadcast %cst_7 : f32 to vector<1x512xf32>
    %17 = arith.maximumf %15, %16 : vector<1x512xf32>
    %18 = math.rsqrt %17 : vector<1x512xf32>
    %19 = arith.mulf %4, %18 : vector<1x512xf32>
    %20 = arith.mulf %19, %19 : vector<1x512xf32>
    %cst_8 = arith.constant dense<0.000000e+00> : vector<1xf32>
    %21 = vector.multi_reduction <add>, %20, %cst_8 [1] : vector<1x512xf32> to vector<1xf32>
    %22 = vector.shape_cast %21 : vector<1xf32> to vector<1x1xf32>
    %23 = vector.shape_cast %22 : vector<1x1xf32> to vector<1x1x1xf32>
    %c0_9 = arith.constant 0 : index
    %c0_10 = arith.constant 0 : index
    %c0_11 = arith.constant 0 : index
    %24 = vector.load %arg3[%c0_9, %c0_10, %c0_11] : memref<1x1x1xf32, #tpu.memory_space<vmem>>, vector<1x1x1xf32>
    tpu.vector_store %arg3[%c0_9, %c0_10, %c0_11], %23 {strides = array<i32>} : memref<1x1x1xf32, #tpu.memory_space<vmem>>, vector<1x1x1xf32>,
    return
  }
  func.func @transform_0(%arg0: i32) -> (i32, i32) {
    %c0_i32 = arith.constant 0 : i32
    %c0_i32_0 = arith.constant 0 : i32
    return %c0_i32, %arg0 : i32, i32
  }
  func.func @transform_1(%arg0: i32) -> (i32, i32) {
    %c0_i32 = arith.constant 0 : i32
    %c0_i32_0 = arith.constant 0 : i32
    return %c0_i32, %arg0 : i32, i32
  }
  func.func @transform_2(%arg0: i32) -> (i32, i32, i32) {
    %c0_i32 = arith.constant 0 : i32
    %c0_i32_0 = arith.constant 0 : i32
    %c0_i32_1 = arith.constant 0 : i32
    return %arg0, %c0_i32, %c0_i32_0 : i32, i32, i32
  }
}

</mosaic_0001>

<bundles_post_ra>
// kernel: normal_loss.1
= control target key start
LH: loop header
LB: loop body
LE: loop exit
PB: predicated region body
PF: predicated region fallthrough
CT: control target
= control target key end

     0   :  { %s421_s9 = smov 0   ;;  %s458_s0 = inlined_call_operand.vmem [shape: f32[3,1024], index: 0, kind: input, shape index: {}]   ;;  %s459_s1 = inlined_call_operand.vmem [shape: f32[3,1024], index: 1, kind: input, shape index: {}]   ;;  %s460_s2 = inlined_call_operand.vmem [shape: f32[2,1,1], index: 2, kind: output, shape index: {}]  }
   0x1 LB: > { %s427_s10 = sadd.s32 4294967295, %s404_s9   ;;  %p375_p0 = scmp.ge.s32.totalorder %s404_s9, 1  ;;  %s404_s9 = sphi %s421_s9, %s12_s9  }
   0x2   : > { %p124_p1 = scmp.lt.s32.totalorder %s404_s9, 3 }
   0x4   : > { %p125_p2 = pnand %p375_p0, %p124_p1 }
   0x5   : > { %s376_s11 = sshll.u32 (!%p125_p2), %s427_s10, 2  ;;  %vm176_vm0 = vcmask (!%p125_p2), 1042432   ;;  %p161_p4 = scmp.lt.s32.totalorder (!%p125_p2), %s427_s10, 1  ;;  %vm310_vm1 = vcmask (!%p125_p2), 0  }
   0x6   : > { %128 = sbr.rel (%p125_p2) target bundleno = 209 (0xd1), region = 28  ;;  %p150_p3 = scmp.lt.s32.totalorder (!%p125_p2), %s376_s11, 7 }
   0xd   : > { %s462_s11 = smov (!%p150_p3, %s376_s11), 7  ;;  %s464_s10 = smov (!%p161_p4, %s427_s10), 1 }
   0xe   : > { %s377_s12 = sshll.u32 %s462_s11, 2  ;;  %s163_s21 = scalar_lea.vmem %s460_s2, %s464_s10 }
   0xf   : > { %s153_s15 = scalar_lea.vmem %s458_s0, %s377_s12  ;;  %s159_s18 = scalar_lea.vmem %s459_s1, %s377_s12 }
  0x10   : > { %v164_v0 = vld [vmem:[%s153_s15] sm:$0x77]  ;;  %v165_v1 = vld [vmem:[%s153_s15 + $0x8] sm:$0x77] }
  0x11   : > { %v205_v2 = vmul.f32 %v164_v0, %v164_v0  ;;  %v206_v3 = vmul.f32 %v165_v1, %v165_v1  ;;  %v166_v13 = vld [vmem:[%s159_s18] sm:$0x77]  ;;  %v167_v16 = vld [vmem:[%s159_s18 + $0x8] sm:$0x77] }
  0x12   : > { %v168_v18 = vmul.f32 %v166_v13, %v164_v0  ;;  %v169_v20 = vmul.f32 %v167_v16, %v165_v1  ;;  %v241_v22 = vmul.f32 %v166_v13, %v166_v13  ;;  %v242_v26 = vmul.f32 %v167_v16, %v167_v16 }
  0x13   : > { %v209_v4 = vcombine.high %v205_v2, %v205_v2  ;;  %v213_v5 = vsel %vm176_vm0, %v205_v2, 0.0  ;;  %v210_v6 = vcombine.high %v206_v3, %v206_v3  ;;  %v227_v10 = vsel %vm176_vm0, %v206_v3, 0.0 }
  0x14   : > { %v214_v7 = vrot.slane %v213_v5, 4  ;;  %v228_v12 = vrot.slane %v227_v10, 4  ;;  %v172_v27 = vcombine.high %v168_v18, %v168_v18  ;;  %v173_v29 = vcombine.high %v169_v20, %v169_v20 }
  0x15   : > { %v220_v8 = vsel %vm176_vm0, %v209_v4, 0.0  ;;  %v234_v15 = vsel %vm176_vm0, %v210_v6, 0.0  ;;  %v177_v30 = vsel %vm176_vm0, %v168_v18, 0.0  ;;  %v245_v32 = vcombine.high %v241_v22, %v241_v22 }
  0x16   : > { %v221_v9 = vrot.slane %v220_v8, 4  ;;  %v215_v11 = vadd.f32 %v214_v7, %v213_v5  ;;  %v229_v17 = vadd.f32 %v228_v12, %v227_v10  ;;  %v235_v19 = vrot.slane %v234_v15, 4 }
  0x17   : > { %v246_v35 = vcombine.high %v242_v26, %v242_v26  ;;  %v249_v36 = vsel %vm176_vm0, %v241_v22, 0.0  ;;  %v256_v39 = vsel %vm176_vm0, %v245_v32, 0.0  ;;  %v263_v40 = vsel %vm176_vm0, %v242_v26, 0.0 }
  0x18   : > { %v222_v14 = vadd.f32 %v221_v9, %v220_v8  ;;  %v216_v21 = vrot.slane %v215_v11, 2  ;;  %v230_v24 = vrot.slane %v229_v17, 2  ;;  %v236_v25 = vadd.f32 %v235_v19, %v234_v15 }
  0x19   : > { %v250_v38 = vrot.slane %v249_v36, 4  ;;  %v191_v41 = vsel %vm176_vm0, %v169_v20, 0.0  ;;  %v257_v42 = vrot.slane %v256_v39, 4  ;;  %v264_v43 = vrot.slane %v263_v40, 4 }
  0x1a   : > { %v223_v23 = vrot.slane %v222_v14, 2  ;;  %v237_v28 = vrot.slane %v236_v25, 2  ;;  %v217_v31 = vadd.f32 %v216_v21, %v215_v11  ;;  %v231_v34 = vadd.f32 %v230_v24, %v229_v17 }
  0x1b   : > { %v270_v44 = vsel %vm176_vm0, %v246_v35, 0.0  ;;  %v184_v45 = vsel %vm176_vm0, %v172_v27, 0.0  ;;  %v251_v47 = vadd.f32 %v250_v38, %v249_v36  ;;  %v258_v51 = vadd.f32 %v257_v42, %v256_v39 }
  0x1c   : > { %v224_v33 = vadd.f32 %v223_v23, %v222_v14  ;;  %v238_v37 = vadd.f32 %v237_v28, %v236_v25  ;;  %v218_v46 = vrot.slane %v217_v31, 1  ;;  %v271_v48 = vrot.slane %v270_v44, 4 }
  0x1d   : > { %v232_v50 = vrot.slane %v231_v34, 1  ;;  %v265_v52 = vadd.f32 %v264_v43, %v263_v40  ;;  %v178_v53 = vrot.slane %v177_v30, 4  ;;  %v252_v55 = vrot.slane %v251_v47, 2 }
  0x1e   : > { %v225_v49 = vrot.slane %v224_v33, 1  ;;  %v239_v54 = vrot.slane %v238_v37, 1  ;;  %v272_v56 = vadd.f32 %v271_v48, %v270_v44  ;;  %v192_v57 = vrot.slane %v191_v41, 4 }
  0x1f   : > { %v198_v58 = vsel %vm176_vm0, %v173_v29, 0.0  ;;  %v259_v59 = vrot.slane %v258_v51, 2  ;;  %v266_v60 = vrot.slane %v265_v52, 2  ;;  %v185_v61 = vrot.slane %v184_v45, 4 }
  0x20   : > { %v219_v62 = vadd.f32 %v218_v46, %v217_v31  ;;  %v253_v63 = vadd.f32 %v252_v55, %v251_v47  ;;  %v273_v0 = vrot.slane %v272_v56, 2  ;;  %v226_v1 = vadd.f32 %v225_v49, %v224_v33 }
  0x21   : > { %v233_v2 = vadd.f32 %v232_v50, %v231_v34  ;;  %v260_v3 = vadd.f32 %v259_v59, %v258_v51  ;;  %v267_v4 = vadd.f32 %v266_v60, %v265_v52  ;;  %v199_v5 = vrot.slane %v198_v58, 4 }
  0x22   : > { %v240_v6 = vadd.f32 %v239_v54, %v238_v37  ;;  %v254_v7 = vrot.slane %v253_v63, 1  ;;  %v274_v8 = vadd.f32 %v273_v0, %v272_v56  ;;  %v179_v9 = vadd.f32 %v178_v53, %v177_v30 }
  0x23   : > { %v193_v10 = vadd.f32 %v192_v57, %v191_v41  ;;  %v261_v11 = vrot.slane %v260_v3, 1  ;;  %v268_v12 = vrot.slane %v267_v4, 1  ;;  %v186_v13 = vadd.f32 %v185_v61, %v184_v45 }
  0x24   : > { %v255_v14 = vadd.f32 %v254_v7, %v253_v63  ;;  %v275_v15 = vrot.slane %v274_v8, 1  ;;  %v277_v16 = vmax.f32 %v219_v62, 1e-24  ;;  %v278_v19 = vmax.f32 %v226_v1, 1e-24 }
  0x25   : > { %v262_v17 = vadd.f32 %v261_v11, %v260_v3  ;;  %v269_v18 = vadd.f32 %v268_v12, %v267_v4  ;;  %v279_v20 = vmax.f32 %v233_v2, 1e-24  ;;  %v200_v21 = vadd.f32 %v199_v5, %v198_v58 }
  0x26   : > { %v276_v22 = vadd.f32 %v275_v15, %v274_v8  ;;  %v280_v23 = vmax.f32 %v240_v6, 1e-24  ;;  %v281_v24 = vmax.f32 %v255_v14, 1e-24  ;;  %v180_v25 = vrot.slane %v179_v9, 2 }
  0x27   : > { %v282_v26 = vmax.f32 %v262_v17, 1e-24  ;;  %v283_v27 = vmax.f32 %v269_v18, 1e-24  ;;  %v187_v28 = vrot.slane %v186_v13, 2  ;;  %v194_v31 = vrot.slane %v193_v10, 2 }
  0x28   : > { %v284_v29 = vmax.f32 %v276_v22, 1e-24  ;;  %v285_v30 = vmul.f32 %v281_v24, %v277_v16  ;;  %v201_v34 = vrot.slane %v200_v21, 2  ;;  %v181_v37 = vadd.f32 %v180_v25, %v179_v9 }
  0x29   : > { %v286_v32 = vmul.f32 %v282_v26, %v278_v19  ;;  %v287_v33 = vmul.f32 %v283_v27, %v279_v20  ;;  %v188_v40 = vadd.f32 %v187_v28, %v186_v13  ;;  %v195_v42 = vadd.f32 %v194_v31, %v193_v10 }
  0x2a   : > { %v288_v35 = vmul.f32 %v284_v29, %v280_v23  ;;  %v289_v36 = vmax.f32 %v285_v30, 1.2e-38  ;;  %v202_v43 = vadd.f32 %v201_v34, %v200_v21  ;;  %v182_v44 = vrot.slane %v181_v37, 1 }
  0x2b   : > { %v290_v38 = vmax.f32 %v286_v32, 1.2e-38  ;;  %v291_v39 = vmax.f32 %v287_v33, 1.2e-38  ;;  %v189_v45 = vrot.slane %v188_v40, 1  ;;  %v196_v46 = vrot.slane %v195_v42, 1 }
  0x2c   : > { %v292_v41 = vmax.f32 %v288_v35, 1.2e-38  ;;  %390 = vrsqrt.f32 %v289_v36  ;;  %v203_v47 = vrot.slane %v202_v43, 1  ;;  %v183_v48 = vadd.f32 %v182_v44, %v181_v37 }
  0x2d   : > { %392 = vrsqrt.f32 %v290_v38  ;;  %v190_v49 = vadd.f32 %v189_v45, %v188_v40  ;;  %v197_v50 = vadd.f32 %v196_v46, %v195_v42 }
  0x2e   : > { %394 = vrsqrt.f32 %v291_v39  ;;  %v204_v52 = vadd.f32 %v203_v47, %v202_v43 }
  0x2f   : > { %396 = vrsqrt.f32 %v292_v41 }
  0x36   : > { %v391_v51 = vpop.eup %390 }
  0x37   : > { %v393_v53 = vpop.eup %392  ;;  %v297_v54 = vmul.f32 %v391_v51, %v183_v48 }
  0x38   : > { %v395_v55 = vpop.eup %394  ;;  %v298_v56 = vmul.f32 %v393_v53, %v190_v49 }
  0x39   : > { %v397_v57 = vpop.eup %396  ;;  %v299_v58 = vmul.f32 %v395_v55, %v197_v50  ;;  %v301_v59 = vmul.f32 %v297_v54, %v297_v54 }
  0x3a   : > { %v300_v60 = vmul.f32 %v397_v57, %v204_v52  ;;  %v302_v61 = vmul.f32 %v298_v56, %v298_v56 }
  0x3b   : > { %v303_v62 = vmul.f32 %v299_v58, %v299_v58 }
  0x3c   : > { %v304_v63 = vmul.f32 %v300_v60, %v300_v60  ;;  %v305_v0 = vadd.f32 %v302_v61, %v301_v59 }
  0x3e   : > { %v306_v1 = vadd.f32 %v305_v0, %v303_v62 }
  0x40   : > { %v307_v2 = vadd.f32 %v306_v1, %v304_v63 }
  0x42   : > { %308 = vadd.xlane.f32.xlu0 %v307_v2 }
  0xcf   : > { %v309_v3 = vpop.xlane.xlu0 %308 }
  0xd0   : > { %311 = vst.msk [vmem:[%s163_s21] sm:$0x1] %vm310_vm1, %v309_v3 }
  0xd1 PF: > { %s12_s9 = sadd.s32 1, %s404_s9  }
  0xd2   : > { %p9_p5 = scmp.ge.s32.totalorder %s12_s9, 4  }
  0xd4   :  { %11 = sbr.rel (!%p9_p5) target bundleno = 1 (0x1), region = 61 }

</bundles_post_ra>
